<compile_context>
chip_gen: v7x
topology: tpu7x:2x2x1
jax: 0.10.0
libtpu: 0.0.40
codegen_flags: <defaults>
</compile_context>

<pallas_src>
import jax
import jax.numpy as jnp
from jax.experimental import pallas as pl
from jax.experimental.pallas import tpu as pltpu


def channel_attention_kernel(x_ref, w1_ref, b1_ref, w2_ref, b2_ref, o_ref):
    # x_ref: (Bt, C, HW)  w1_ref: (C, Ch)  b1_ref: (1, Ch)
    # w2_ref: (Ch, C)     b2_ref: (1, C)   o_ref: (Bt, C, HW)
    x = x_ref[...]                                            # (Bt, C, HW)

    # --- AdaptiveAvgPool2d(1): mean over spatial dim (f32 accumulate) ---
    y = jnp.mean(x, axis=-1, dtype=jnp.float32)               # (Bt, C)

    # --- fc: Linear(C -> C//16) + ReLU  (M = Bt, batched) ---
    h = jnp.dot(y, w1_ref[...], preferred_element_type=jnp.float32)
    h = jnp.maximum(h + b1_ref[...], 0.0)                     # (Bt, Ch)

    # --- Linear(C//16 -> C) + Sigmoid ---
    s = jnp.dot(h, w2_ref[...], preferred_element_type=jnp.float32)
    s = jax.nn.sigmoid(s + b2_ref[...])                       # (Bt, C)

    # --- channel-wise rescale, broadcast over spatial dim (native dtype) ---
    # (gate relayout lane->sublane here is a few vregs; DMA-bound, left as-is)
    o_ref[...] = (x * s[:, :, None].astype(x.dtype)).astype(o_ref.dtype)


def _tpu_topology():
    """Best-effort (num_tensorcores, vmem_capacity_bytes) with safe defaults."""
    num_cores = 1
    vmem_cap = 64 << 20          # conservative default (v7x per-TC physical)
    try:
        info = pltpu.get_tpu_info()
        for name in ("tensorcore_count", "num_tensorcores", "num_cores",
                     "core_count"):
            v = getattr(info, name, None)
            if isinstance(v, int) and v > 0:
                num_cores = v
                break
        v = getattr(info, "vmem_capacity_bytes", None)
        if isinstance(v, int) and v > 0:
            vmem_cap = v
    except Exception:
        pass
    if num_cores == 1:
        try:
            if "v7" in jax.devices()[0].device_kind.lower():
                num_cores = 2
        except Exception:
            pass
    return num_cores, vmem_cap


def _pick_batch_tile(B, bt_cap, num_cores):
    """Largest divisor of B that fits the block budget.

    Prefers (a) divisors whose step count splits evenly across TensorCores on
    multi-core chips, and (b) multiples of 8 (sublane-aligned pooled/MLP
    tiles) when that costs at most a 2x smaller block. Guarantees no padding.
    """
    bt_cap = max(1, min(bt_cap, B))
    candidates = [d for d in range(1, bt_cap + 1) if B % d == 0]

    def score(d):
        steps = B // d
        balanced = (num_cores <= 1) or (steps % num_cores == 0)
        return (balanced, d)

    best = max(candidates, key=score)
    aligned = [d for d in candidates if d % 8 == 0 and 2 * d >= best]
    if aligned:
        best_aligned = max(aligned, key=score)
        if score(best_aligned)[0] >= score(best)[0]:
            best = best_aligned
    return best


def channel_attention(x, w1, b1, w2, b2, *, block_bytes=4 << 20):
    """x: (B, C, H, W); returns same shape/dtype as the PyTorch forward."""
    B, C, H, W = x.shape
    HW = H * W
    Ch = w1.shape[1]
    itemsize = jnp.dtype(x.dtype).itemsize

    num_cores, vmem_cap = _tpu_topology()

    # Block sizing: target ~block_bytes per x block, but keep the
    # double-buffered in+out footprint (4x block) within ~60% of VMEM.
    row_bytes = C * HW * itemsize
    max_block_bytes = max(row_bytes, (vmem_cap * 6 // 10) // 4)
    tgt_block_bytes = min(block_bytes, max_block_bytes)
    bt_cap = max(1, tgt_block_bytes // row_bytes)
    Bt = _pick_batch_tile(B, bt_cap, num_cores)
    grid_b = B // Bt                       # exact: Bt divides B, no padding

    x_flat = x.reshape(B, C, HW)
    # TODO(synk): for small feature maps (H*W not a multiple of 128), fold a
    # factor of C into the last axis to keep output stores lane-dense.

    block_nbytes = Bt * row_bytes
    weight_nbytes = sum(int(a.size) * jnp.dtype(a.dtype).itemsize
                        for a in (w1, b1, w2, b2))
    needed = 4 * block_nbytes + 2 * weight_nbytes + (2 << 20)
    vmem_limit = int(min(max(needed, 16 << 20), vmem_cap))

    cost = pl.CostEstimate(
        flops=2 * B * C * HW + 4 * B * C * Ch,
        transcendentals=B * C,
        bytes_accessed=2 * B * C * HW * itemsize + weight_nbytes,
    )

    out_flat = pl.pallas_call(
        channel_attention_kernel,
        out_shape=jax.ShapeDtypeStruct((B, C, HW), x.dtype),
        grid_spec=pltpu.PrefetchScalarGridSpec(
            num_scalar_prefetch=0,
            grid=(grid_b,),
            in_specs=[
                pl.BlockSpec((Bt, C, HW), lambda b: (b, 0, 0)),  # x (batch tile)
                pl.BlockSpec((C, Ch), lambda b: (0, 0)),         # w1 (resident)
                pl.BlockSpec((1, Ch), lambda b: (0, 0)),         # b1
                pl.BlockSpec((Ch, C), lambda b: (0, 0)),         # w2
                pl.BlockSpec((1, C), lambda b: (0, 0)),          # b2
            ],
            out_specs=pl.BlockSpec((Bt, C, HW), lambda b: (b, 0, 0)),
        ),
        compiler_params=pltpu.CompilerParams(
            dimension_semantics=("parallel",),
            vmem_limit_bytes=vmem_limit,
        ),
        cost_estimate=cost,
    )(x_flat, w1, b1, w2, b2)

    return out_flat.reshape(B, C, H, W)


def reference(x, w1, b1, w2, b2):
    """Plain-JAX reference mirroring the PyTorch forward."""
    y = jnp.mean(x, axis=(2, 3))                         # (B, C)
    h = jnp.maximum(y @ w1 + b1, 0.0)                    # (B, Ch)
    s = jax.nn.sigmoid(h @ w2 + b2)                      # (B, C)
    return x * s[:, :, None, None]


if __name__ == "__main__":
    # in_channels must be >= 16 so that hidden = C // 16 >= 1
    B, C, H, W = 8, 32, 16, 16
    Ch = C // 16

    key = jax.random.PRNGKey(0)
    kx, k1, k2, k3, k4 = jax.random.split(key, 5)

    x = jax.random.normal(kx, (B, C, H, W), dtype=jnp.float32)

    # Linear weights stored as (in, out) so the kernel computes y @ W + b,
    # equivalent to PyTorch's y @ W.T + b with W_pytorch = W.T.
    w1 = jax.random.normal(k1, (C, Ch), dtype=jnp.float32) * 0.1
    b1 = jax.random.normal(k2, (1, Ch), dtype=jnp.float32) * 0.1
    w2 = jax.random.normal(k3, (Ch, C), dtype=jnp.float32) * 0.1
    b2 = jax.random.normal(k4, (1, C), dtype=jnp.float32) * 0.1

    out = channel_attention(x, w1, b1, w2, b2)
    out = jax.block_until_ready(out)

    ref = reference(x, w1, b1, w2, b2)
    assert out.shape == (B, C, H, W)
    assert jnp.allclose(out, ref, atol=1e-5, rtol=1e-5), (
        f"max abs err {jnp.max(jnp.abs(out - ref))}")

    print("KERNEL_OK")
</pallas_src>

<mosaic_0001>
module attributes {stable_mosaic.version = 11 : i64} {
  func.func @channel_attention_kernel(%arg0: i32, %arg1: memref<8x32x256xf32, #tpu.memory_space<vmem>>, %arg2: memref<32x2xf32, #tpu.memory_space<vmem>>, %arg3: memref<1x2xf32, #tpu.memory_space<vmem>>, %arg4: memref<2x32xf32, #tpu.memory_space<vmem>>, %arg5: memref<1x32xf32, #tpu.memory_space<vmem>>, %arg6: memref<8x32x256xf32, #tpu.memory_space<vmem>>) attributes {dimension_semantics = [#tpu.dimension_semantics<parallel>], iteration_bounds = array<i64: 1>, scalar_prefetch = 0 : i64, scratch_operands = 0 : i64, tpu.core_type = #tpu.core_type<tc>, window_params = [{transform_indices = @transform_0, window_bounds = array<i64: 8, 32, 256>}, {pipeline_mode = #tpu.pipeline_mode<synchronous>, transform_indices = @transform_1, window_bounds = array<i64: 32, 2>}, {pipeline_mode = #tpu.pipeline_mode<synchronous>, transform_indices = @transform_2, window_bounds = array<i64: 1, 2>}, {pipeline_mode = #tpu.pipeline_mode<synchronous>, transform_indices = @transform_3, window_bounds = array<i64: 2, 32>}, {pipeline_mode = #tpu.pipeline_mode<synchronous>, transform_indices = @transform_4, window_bounds = array<i64: 1, 32>}, {transform_indices = @transform_5, window_bounds = array<i64: 8, 32, 256>}]} {
    %c0 = arith.constant 0 : index
    %c0_0 = arith.constant 0 : index
    %c0_1 = arith.constant 0 : index
    %0 = vector.load %arg1[%c0, %c0_0, %c0_1] : memref<8x32x256xf32, #tpu.memory_space<vmem>>, vector<8x32x256xf32>
    %cst = arith.constant dense<0.000000e+00> : vector<8x32xf32>
    %1 = vector.multi_reduction <add>, %0, %cst [2] : vector<8x32x256xf32> to vector<8x32xf32>
    %cst_2 = arith.constant 2.560000e+02 : f32
    %2 = vector.broadcast %cst_2 : f32 to vector<8x32xf32>
    %3 = arith.divf %1, %2 : vector<8x32xf32>
    %c0_3 = arith.constant 0 : index
    %c0_4 = arith.constant 0 : index
    %4 = vector.load %arg2[%c0_3, %c0_4] : memref<32x2xf32, #tpu.memory_space<vmem>>, vector<32x2xf32>
    %cst_5 = arith.constant dense<0.000000e+00> : vector<8x2xf32>
    %5 = tpu.matmul %3, %4, %cst_5 {dimension_numbers = #tpu.dot_dimension_numbers<[1], [0], [0], [1], [0, 0, 1, 1], [], []>} : vector<8x32xf32>, vector<32x2xf32>, vector<8x2xf32> -> vector<8x2xf32>
    %c0_6 = arith.constant 0 : index
    %c0_7 = arith.constant 0 : index
    %6 = vector.load %arg3[%c0_6, %c0_7] : memref<1x2xf32, #tpu.memory_space<vmem>>, vector<1x2xf32>
    %7 = vector.broadcast %6 : vector<1x2xf32> to vector<8x2xf32>
    %8 = arith.addf %5, %7 : vector<8x2xf32>
    %cst_8 = arith.constant 0.000000e+00 : f32
    %9 = vector.broadcast %cst_8 : f32 to vector<8x2xf32>
    %10 = arith.maximumf %8, %9 : vector<8x2xf32>
    %c0_9 = arith.constant 0 : index
    %c0_10 = arith.constant 0 : index
    %11 = vector.load %arg4[%c0_9, %c0_10] : memref<2x32xf32, #tpu.memory_space<vmem>>, vector<2x32xf32>
    %cst_11 = arith.constant dense<0.000000e+00> : vector<8x32xf32>
    %12 = tpu.matmul %10, %11, %cst_11 {dimension_numbers = #tpu.dot_dimension_numbers<[1], [0], [0], [1], [0, 0, 1, 1], [], []>} : vector<8x2xf32>, vector<2x32xf32>, vector<8x32xf32> -> vector<8x32xf32>
    %c0_12 = arith.constant 0 : index
    %c0_13 = arith.constant 0 : index
    %13 = vector.load %arg5[%c0_12, %c0_13] : memref<1x32xf32, #tpu.memory_space<vmem>>, vector<1x32xf32>
    %14 = vector.broadcast %13 : vector<1x32xf32> to vector<8x32xf32>
    %15 = arith.addf %12, %14 : vector<8x32xf32>
    %16 = arith.negf %15 : vector<8x32xf32>
    %17 = math.exp %16 : vector<8x32xf32>
    %cst_14 = arith.constant 1.000000e+00 : f32
    %18 = vector.broadcast %cst_14 : f32 to vector<8x32xf32>
    %19 = arith.addf %18, %17 : vector<8x32xf32>
    %20 = arith.divf %18, %19 : vector<8x32xf32>
    %21 = vector.shape_cast %20 : vector<8x32xf32> to vector<8x32x1xf32>
    %22 = vector.broadcast %21 : vector<8x32x1xf32> to vector<8x32x256xf32>
    %23 = arith.mulf %0, %22 : vector<8x32x256xf32>
    %c0_15 = arith.constant 0 : index
    %c0_16 = arith.constant 0 : index
    %c0_17 = arith.constant 0 : index
    %24 = vector.load %arg6[%c0_15, %c0_16, %c0_17] : memref<8x32x256xf32, #tpu.memory_space<vmem>>, vector<8x32x256xf32>
    tpu.vector_store %arg6[%c0_15, %c0_16, %c0_17], %23 {strides = array<i32>} : memref<8x32x256xf32, #tpu.memory_space<vmem>>, vector<8x32x256xf32>,
    return
  }
  func.func @transform_0(%arg0: i32) -> (i32, i32, i32) {
    %c0_i32 = arith.constant 0 : i32
    %c0_i32_0 = arith.constant 0 : i32
    %c0_i32_1 = arith.constant 0 : i32
    return %arg0, %c0_i32, %c0_i32_0 : i32, i32, i32
  }
  func.func @transform_1(%arg0: i32) -> (i32, i32) {
    %c0_i32 = arith.constant 0 : i32
    %c0_i32_0 = arith.constant 0 : i32
    %c0_i32_1 = arith.constant 0 : i32
    return %c0_i32, %c0_i32_0 : i32, i32
  }
  func.func @transform_2(%arg0: i32) -> (i32, i32) {
    %c0_i32 = arith.constant 0 : i32
    %c0_i32_0 = arith.constant 0 : i32
    %c0_i32_1 = arith.constant 0 : i32
    return %c0_i32, %c0_i32_0 : i32, i32
  }
  func.func @transform_3(%arg0: i32) -> (i32, i32) {
    %c0_i32 = arith.constant 0 : i32
    %c0_i32_0 = arith.constant 0 : i32
    %c0_i32_1 = arith.constant 0 : i32
    return %c0_i32, %c0_i32_0 : i32, i32
  }
  func.func @transform_4(%arg0: i32) -> (i32, i32) {
    %c0_i32 = arith.constant 0 : i32
    %c0_i32_0 = arith.constant 0 : i32
    %c0_i32_1 = arith.constant 0 : i32
    return %c0_i32, %c0_i32_0 : i32, i32
  }
  func.func @transform_5(%arg0: i32) -> (i32, i32, i32) {
    %c0_i32 = arith.constant 0 : i32
    %c0_i32_0 = arith.constant 0 : i32
    %c0_i32_1 = arith.constant 0 : i32
    return %arg0, %c0_i32, %c0_i32_0 : i32, i32, i32
  }
}

</mosaic_0001>

<bundles_post_ra>
// kernel: tpu_custom_call.1
= control target key start
LH: loop header
LB: loop body
LE: loop exit
PB: predicated region body
PF: predicated region fallthrough
CT: control target
= control target key end

     0   :  { %10 = vsyncpa [#allocation3], 0  ;;  %s1433_s0 = inlined_call_operand.hbm [shape: f32[8,32,256], index: 0, kind: input, shape index: {}]   ;;  %s1434_s1 = inlined_call_operand.vmem [shape: f32[32,2], index: 1, kind: input, shape index: {}]   ;;  %s1435_s2 = inlined_call_operand.vmem [shape: f32[1,2], index: 2, kind: input, shape index: {}]   ;;  %s1436_s3 = inlined_call_operand.vmem [shape: f32[2,32], index: 3, kind: input, shape index: {}]   ;;  %s1437_s4 = inlined_call_operand.vmem [shape: f32[1,32], index: 4, kind: input, shape index: {}]   ;;  %s1438_s5 = inlined_call_operand.hbm [shape: f32[8,32,256], index: 5, kind: output, shape index: {}]  }
   0x1   :  { %11 = vsyncpa [#allocation4], 0  ;;  %s1002_s18 = smov [#allocation2]   ;;  %s954_s22 = scalar_lea.hbm %s1433_s0, 8192 }
   0x2   :  { %s17_s19 = sshll.u32 %s1002_s18, 4  ;;  %p955_p0 = scmp.ne.s32.totalorder %s1433_s0, %s954_s22  ;;  %s18_s19 = int_to_ptr.vmem [resolvable:$true] %s17_s19 }
   0x3   :  { %p958_p1 = scmp.lt.u32.totalorder %s954_s22, %s1433_s0 }
   0x5   :  { %p960_p2 = pnand %p958_p1, %p955_p0 }
   0x7   :  { %963 = shalt.err (!%p960_p2)
}
   0x8   :  { %s964_s27 = scalar_lea.vmem %s18_s19, 8192  ;;  %p969_p4 = scmp.lt.s32.totalorder %s18_s19, %s18_s19 }
   0x9   :  { %p965_p3 = scmp.ne.s32.totalorder %s18_s19, %s964_s27  ;;  %p970_p5 = scmp.lt.s32.totalorder %s964_s27, %s964_s27 }
   0xb   :  { %p971_p6 = por %p970_p5, %p969_p4 }
   0xd   :  { %p972_p7 = pnand %p971_p6, %p965_p3 }
   0xf   :  { %975 = shalt.err (!%p972_p7)
}
  0x10   :  { %s1003_s28 = smov 256   ;;  %s1004_s29 = smov 16  }
  0x11   :  { %23 = dma.hbm_to_vmem [thread:$0]  %s1433_s0, 8192, %s18_s19, [#allocation3], %s1003_s28, %s1003_s28, %s1004_s29  }
  0x12   :  { %998 = dma.done.wait [#allocation3], 8192  }
  0x13   :  { %999 = vsyncadd [#allocation3], 4294959104  ;;  %v1054_v0 = vld [vmem:[#allocation2 + $0x40] sm:$0xff]  ;;  %v1056_v1 = vld [vmem:[#allocation2 + $0x48] sm:$0xff]  ;;  %vm1006_vm0 = vmmov 0   ;;  %vm282_vm1 = vcmask 130112  }
  0x14   :  { %v1058_v2 = vld [vmem:[#allocation2] sm:$0xff]  ;;  %v111_v3 = vadd.f32 %v1056_v1, %v1054_v0  ;;  %v1062_v4 = vld [vmem:[#allocation2 + $0x8] sm:$0xff]  ;;  %v1064_v5 = vld [vmem:[#allocation2 + $0x50] sm:$0xff]  ;;  %vm289_vm2 = vcmask 195712   ;;  %vm296_vm3 = vcmask 261312   ;;  %vm431_vm4 = vcmask 1041409  }
  0x15   :  { %v1066_v6 = vld [vmem:[#allocation2 + $0x58] sm:$0xff]  ;;  %v99_v7 = vadd.f32 %v1062_v4, %v1058_v2  ;;  %v1070_v8 = vld [vmem:[#allocation2 + $0x10] sm:$0xff]  ;;  %v1078_v12 = vld [vmem:[#allocation2 + $0x60] sm:$0xff]  ;;  %vm433_vm5 = vcmask 1042434   ;;  %vm435_vm6 = vcmask 1043459   ;;  %vm437_vm7 = vcmask 1044484  }
  0x16   :  { %v1072_v9 = vld [vmem:[#allocation2 + $0x18] sm:$0xff]  ;;  %112 = vadd.xlane.f32.xlu1 %v111_v3  ;;  %v114_v10 = vadd.f32 %v1066_v6, %v1064_v5  ;;  %v1080_v13 = vld [vmem:[#allocation2 + $0x68] sm:$0xff]  ;;  %v1082_v14 = vld [vmem:[#allocation2 + $0x20] sm:$0xff]  ;;  %vm439_vm8 = vcmask 1045509   ;;  %vm441_vm9 = vcmask 1046534   ;;  %vm443_vm10 = vcmask 1047559  }
  0x17   :  { %100 = vadd.xlane.f32.xlu0 %v99_v7  ;;  %v102_v11 = vadd.f32 %v1072_v9, %v1070_v8  ;;  %v1084_v15 = vld [vmem:[#allocation2 + $0x28] sm:$0xff]  ;;  %v117_v16 = vadd.f32 %v1080_v13, %v1078_v12  ;;  %v1090_v18 = vld [vmem:[#allocation2 + $0x90] sm:$0xff]  ;;  %v1092_v19 = vld [vmem:[#allocation2 + $0x98] sm:$0xff]  ;;  %vm445_vm11 = vcmask 261120   ;;  %vm531_vm12 = vcmask 1041408  }
  0x18   :  { %v105_v17 = vadd.f32 %v1084_v15, %v1082_v14  ;;  %v1094_v20 = vld [vmem:[#allocation2 + $0x80] sm:$0xff]  ;;  %v1096_v21 = vld [vmem:[#allocation2 + $0x88] sm:$0xff]  ;;  %v126_v22 = vadd.f32 %v1092_v19, %v1090_v18  ;;  %v1102_v24 = vld [vmem:[#allocation2 + $0x70] sm:$0xff]  ;;  %vm527_vm13 = vcmask 15360  }
  0x19   :  { %v123_v23 = vadd.f32 %v1096_v21, %v1094_v20  ;;  %v1104_v25 = vld [vmem:[#allocation2 + $0x78] sm:$0xff]  ;;  %v1106_v26 = vld [vmem:[#allocation2 + $0x30] sm:$0xff]  ;;  %v1114_v30 = vld [vmem:[#allocation2 + $0xc0] sm:$0xff] }
  0x1a   :  { %115 = vadd.xlane.f32.xlu1 %v114_v10  ;;  %v1108_v27 = vld [vmem:[#allocation2 + $0x38] sm:$0xff]  ;;  %v120_v28 = vadd.f32 %v1104_v25, %v1102_v24  ;;  %v1116_v31 = vld [vmem:[#allocation2 + $0xc8] sm:$0xff]  ;;  %v1118_v32 = vld [vmem:[#allocation2 + $0xa0] sm:$0xff] }
  0x1b   :  { %103 = vadd.xlane.f32.xlu0 %v102_v11  ;;  %v108_v29 = vadd.f32 %v1108_v27, %v1106_v26  ;;  %1480 = vst [vmem:[#allocation8_spill] sm:$0xff] %v1116_v31  ;;  %v1120_v33 = vld [vmem:[#allocation2 + $0xa8] sm:$0xff]  ;;  %v135_v34 = vadd.f32 %v1116_v31, %v1114_v30  ;;  %v1126_v36 = vld [vmem:[#allocation2 + $0xb0] sm:$0xff]  ;;  %v1128_v37 = vld [vmem:[#allocation2 + $0xb8] sm:$0xff] }
  0x1c   :  { %v129_v35 = vadd.f32 %v1120_v33, %v1118_v32  ;;  %1481 = vst [vmem:[#allocation9_spill] sm:$0xff] %v1126_v36  ;;  %1482 = vst [vmem:[#allocation10_spill] sm:$0xff] %v1128_v37  ;;  %v1130_v38 = vld [vmem:[#allocation2 + $0xd0] sm:$0xff]  ;;  %v1132_v39 = vld [vmem:[#allocation2 + $0xd8] sm:$0xff]  ;;  %v132_v40 = vadd.f32 %v1128_v37, %v1126_v36 }
  0x1d   :  { %1483 = vst [vmem:[#allocation11_spill] sm:$0xff] %v1130_v38  ;;  %1484 = vst [vmem:[#allocation12_spill] sm:$0xff] %v1132_v39  ;;  %v138_v41 = vadd.f32 %v1132_v39, %v1130_v38  ;;  %v1138_v42 = vld [vmem:[#allocation2 + $0x100] sm:$0xff]  ;;  %v1140_v43 = vld [vmem:[#allocation2 + $0x108] sm:$0xff] }
  0x1e   :  { %118 = vadd.xlane.f32.xlu1 %v117_v16  ;;  %1485 = vst [vmem:[#allocation13_spill] sm:$0xff] %v1138_v42  ;;  %1486 = vst [vmem:[#allocation14_spill] sm:$0xff] %v1140_v43  ;;  %v1142_v44 = vld [vmem:[#allocation2 + $0xe0] sm:$0xff]  ;;  %v1144_v45 = vld [vmem:[#allocation2 + $0xe8] sm:$0xff]  ;;  %v147_v46 = vadd.f32 %v1140_v43, %v1138_v42 }
  0x1f   :  { %106 = vadd.xlane.f32.xlu0 %v105_v17  ;;  %1487 = vst [vmem:[#allocation15_spill] sm:$0xff] %v1142_v44  ;;  %1488 = vst [vmem:[#allocation16_spill] sm:$0xff] %v1144_v45  ;;  %v141_v47 = vadd.f32 %v1144_v45, %v1142_v44  ;;  %v1150_v48 = vld [vmem:[#allocation2 + $0xf0] sm:$0xff]  ;;  %v1152_v49 = vld [vmem:[#allocation2 + $0xf8] sm:$0xff] }
  0x20   :  { %1489 = vst [vmem:[#allocation17_spill] sm:$0xff] %v1150_v48  ;;  %1490 = vst [vmem:[#allocation18_spill] sm:$0xff] %v1152_v49  ;;  %v1154_v50 = vld [vmem:[#allocation2 + $0x110] sm:$0xff]  ;;  %v1156_v51 = vld [vmem:[#allocation2 + $0x118] sm:$0xff]  ;;  %v144_v52 = vadd.f32 %v1152_v49, %v1150_v48 }
  0x21   :  { %1491 = vst [vmem:[#allocation19_spill] sm:$0xff] %v1154_v50  ;;  %1492 = vst [vmem:[#allocation20_spill] sm:$0xff] %v1156_v51  ;;  %v150_v53 = vadd.f32 %v1156_v51, %v1154_v50  ;;  %v1162_v54 = vld [vmem:[#allocation2 + $0x140] sm:$0xff]  ;;  %v1164_v55 = vld [vmem:[#allocation2 + $0x148] sm:$0xff] }
  0x22   :  { %127 = vadd.xlane.f32.xlu1 %v126_v22  ;;  %1493 = vst [vmem:[#allocation21_spill] sm:$0xff] %v1162_v54  ;;  %1494 = vst [vmem:[#allocation22_spill] sm:$0xff] %v1164_v55  ;;  %v1166_v56 = vld [vmem:[#allocation2 + $0x120] sm:$0xff]  ;;  %v1168_v57 = vld [vmem:[#allocation2 + $0x128] sm:$0xff]  ;;  %v159_v58 = vadd.f32 %v1164_v55, %v1162_v54 }
  0x23   :  { %124 = vadd.xlane.f32.xlu0 %v123_v23  ;;  %1495 = vst [vmem:[#allocation23_spill] sm:$0xff] %v1166_v56  ;;  %1496 = vst [vmem:[#allocation24_spill] sm:$0xff] %v1168_v57  ;;  %v153_v59 = vadd.f32 %v1168_v57, %v1166_v56  ;;  %v1174_v60 = vld [vmem:[#allocation2 + $0x130] sm:$0xff]  ;;  %v1176_v61 = vld [vmem:[#allocation2 + $0x138] sm:$0xff] }
  0x24   :  { %1497 = vst [vmem:[#allocation25_spill] sm:$0xff] %v1174_v60  ;;  %1498 = vst [vmem:[#allocation26_spill] sm:$0xff] %v1176_v61  ;;  %v1178_v62 = vld [vmem:[#allocation2 + $0x150] sm:$0xff]  ;;  %v1180_v63 = vld [vmem:[#allocation2 + $0x158] sm:$0xff]  ;;  %v156_v3 = vadd.f32 %v1176_v61, %v1174_v60 }
  0x25   :  { %1499 = vst [vmem:[#allocation27_spill] sm:$0xff] %v1178_v62  ;;  %1500 = vst [vmem:[#allocation28_spill] sm:$0xff] %v1180_v63  ;;  %v162_v7 = vadd.f32 %v1180_v63, %v1178_v62  ;;  %v1186_v10 = vld [vmem:[#allocation2 + $0x180] sm:$0xff]  ;;  %v1188_v11 = vld [vmem:[#allocation2 + $0x188] sm:$0xff] }
  0x26   :  { %121 = vadd.xlane.f32.xlu1 %v120_v28  ;;  %1501 = vst [vmem:[#allocation29_spill] sm:$0xff] %v1186_v10  ;;  %1502 = vst [vmem:[#allocation30_spill] sm:$0xff] %v1188_v11  ;;  %v1190_v16 = vld [vmem:[#allocation2 + $0x160] sm:$0xff]  ;;  %v1192_v17 = vld [vmem:[#allocation2 + $0x168] sm:$0xff]  ;;  %v171_v22 = vadd.f32 %v1188_v11, %v1186_v10 }
  0x27   :  { %109 = vadd.xlane.f32.xlu0 %v108_v29  ;;  %1503 = vst [vmem:[#allocation31_spill] sm:$0xff] %v1190_v16  ;;  %1504 = vst [vmem:[#allocation32_spill] sm:$0xff] %v1192_v17  ;;  %v165_v23 = vadd.f32 %v1192_v17, %v1190_v16  ;;  %v1198_v28 = vld [vmem:[#allocation2 + $0x170] sm:$0xff]  ;;  %v1200_v29 = vld [vmem:[#allocation2 + $0x178] sm:$0xff] }
  0x28   :  { %1505 = vst [vmem:[#allocation33_spill] sm:$0xff] %v1198_v28  ;;  %1506 = vst [vmem:[#allocation34_spill] sm:$0xff] %v1200_v29 }
  0x2a   :  { %136 = vadd.xlane.f32.xlu1 %v135_v34  ;;  %v1202_v34 = vld [vmem:[#allocation2 + $0x190] sm:$0xff] }
  0x2b   :  { %130 = vadd.xlane.f32.xlu0 %v129_v35  ;;  %1507 = vst [vmem:[#allocation35_spill] sm:$0xff] %v1202_v34  ;;  %v1204_v35 = vld [vmem:[#allocation2 + $0x198] sm:$0xff] }
  0x2c   :  { %1508 = vst [vmem:[#allocation36_spill] sm:$0xff] %v1204_v35 }
  0x2e   :  { %133 = vadd.xlane.f32.xlu1 %v132_v40  ;;  %v168_v40 = vadd.f32 %v1200_v29, %v1198_v28 }
  0x2f   :  { %139 = vadd.xlane.f32.xlu0 %v138_v41  ;;  %v174_v41 = vadd.f32 %v1204_v35, %v1202_v34  ;;  %v1240_v34 = vld [vmem:[#allocation2 + $0x1e8] sm:$0xff] }
  0x30   :  { %1520 = vst [vmem:[#allocation48_spill] sm:$0xff] %v1240_v34 }
  0x32   :  { %148 = vadd.xlane.f32.xlu1 %v147_v46  ;;  %v1210_v46 = vld [vmem:[#allocation2 + $0x1c0] sm:$0xff] }
  0x33   :  { %142 = vadd.xlane.f32.xlu0 %v141_v47  ;;  %1509 = vst [vmem:[#allocation37_spill] sm:$0xff] %v1210_v46  ;;  %v1212_v47 = vld [vmem:[#allocation2 + $0x1c8] sm:$0xff] }
  0x34   :  { %1510 = vst [vmem:[#allocation38_spill] sm:$0xff] %v1212_v47 }
  0x36   :  { %145 = vadd.xlane.f32.xlu1 %v144_v52  ;;  %v1214_v52 = vld [vmem:[#allocation2 + $0x1a0] sm:$0xff] }
  0x37   :  { %151 = vadd.xlane.f32.xlu0 %v150_v53  ;;  %1511 = vst [vmem:[#allocation39_spill] sm:$0xff] %v1214_v52  ;;  %v1216_v53 = vld [vmem:[#allocation2 + $0x1a8] sm:$0xff] }
  0x38   :  { %1512 = vst [vmem:[#allocation40_spill] sm:$0xff] %v1216_v53 }
  0x3a   :  { %160 = vadd.xlane.f32.xlu1 %v159_v58  ;;  %v183_v58 = vadd.f32 %v1212_v47, %v1210_v46  ;;  %v1236_v47 = vld [vmem:[#allocation2 + $0x1f8] sm:$0xff]  ;;  %v1238_v46 = vld [vmem:[#allocation2 + $0x1e0] sm:$0xff] }
  0x3b   :  { %154 = vadd.xlane.f32.xlu0 %v153_v59  ;;  %v177_v59 = vadd.f32 %v1216_v53, %v1214_v52  ;;  %1518 = vst [vmem:[#allocation46_spill] sm:$0xff] %v1236_v47  ;;  %1519 = vst [vmem:[#allocation47_spill] sm:$0xff] %v1238_v46 }
  0x3e   :  { %157 = vadd.xlane.f32.xlu1 %v156_v3  ;;  %v1222_v3 = vld [vmem:[#allocation2 + $0x1b0] sm:$0xff] }
  0x3f   :  { %163 = vadd.xlane.f32.xlu0 %v162_v7  ;;  %1513 = vst [vmem:[#allocation41_spill] sm:$0xff] %v1222_v3  ;;  %v1224_v7 = vld [vmem:[#allocation2 + $0x1b8] sm:$0xff] }
  0x40   :  { %1514 = vst [vmem:[#allocation42_spill] sm:$0xff] %v1224_v7  ;;  %v180_v35 = vadd.f32 %v1224_v7, %v1222_v3  ;;  %v1005_v7 = vmov 0.0|0.0  }
  0x41   :  { %937 = vmatprep.subr.bf16.mxu0 %v1005_v7 }
  0x42   :  { %172 = vadd.xlane.f32.xlu1 %v171_v22  ;;  %v1226_v22 = vld [vmem:[#allocation2 + $0x1d0] sm:$0xff] }
  0x43   :  { %166 = vadd.xlane.f32.xlu0 %v165_v23  ;;  %1515 = vst [vmem:[#allocation43_spill] sm:$0xff] %v1226_v22  ;;  %v1228_v23 = vld [vmem:[#allocation2 + $0x1d8] sm:$0xff] }
  0x44   :  { %1516 = vst [vmem:[#allocation44_spill] sm:$0xff] %v1228_v23 }
  0x46   :  { %169 = vadd.xlane.f32.xlu1 %v168_v40  ;;  %v186_v40 = vadd.f32 %v1228_v23, %v1226_v22  ;;  %v229_v23 = vld [vmem:[%s1434_s1 + $0x8] sm:$0xff] }
  0x47   :  { %175 = vadd.xlane.f32.xlu0 %v174_v41  ;;  %v1234_v41 = vld [vmem:[#allocation2 + $0x1f0] sm:$0xff] }
  0x48   :  { %1517 = vst [vmem:[#allocation45_spill] sm:$0xff] %v1234_v41  ;;  %v192_v53 = vadd.f32 %v1236_v47, %v1234_v41 }
  0x4a   :  { %184 = vadd.xlane.f32.xlu1 %v183_v58  ;;  %v189_v58 = vadd.f32 %v1240_v34, %v1238_v46 }
  0x4b   :  { %178 = vadd.xlane.f32.xlu0 %v177_v59  ;;  %v228_v59 = vld [vmem:[%s1434_s1] sm:$0xff] }
  0x4c   :  { %v938_v22 = vpack.c.bf16 %v229_v23, %v228_v59 }
  0x4e   :  { %181 = vadd.xlane.f32.xlu1 %v180_v35  ;;  %939 = vmatpush3.bf16.msra.mxu0 %v938_v22  ;;  %v230_v35 = vld [vmem:[%s1434_s1 + $0x10] sm:$0xff] }
  0x4f   :  { %187 = vadd.xlane.f32.xlu0 %v186_v40  ;;  %940 = vmatprep.subr.bf16.mxu0 %v1005_v7 }
  0x52   :  { %193 = vadd.xlane.f32.xlu1 %v192_v53  ;;  %v231_v53 = vld [vmem:[%s1434_s1 + $0x18] sm:$0xff] }
  0x53   :  { %190 = vadd.xlane.f32.xlu0 %v189_v58  ;;  %v941_v40 = vpack.c.bf16 %v231_v53, %v230_v35  ;;  %v1007_v58 = vmov 0.0   ;;  %v271_v53 = vlaneseq }
  0x54   :  { %929 = vmatprep.mubr.msk.f32.mxu0 %vm1006_vm0, %v1007_v58  ;;  %932 = vmatprep.subr.mxu1 %v1007_v58 }
  0x55   :  { %942 = vmatpush3.bf16.msra.mxu0 %v941_v40  ;;  %934 = vmatprep.mubr.msk.f32.mxu1 %vm1006_vm0, %v1007_v58  ;;  %v272_v63 = vand.u32 127, %v271_v53  ;;  %v1260_v17 = vshrl.u32 %v271_v53, 7 }
  0x57   :  { %v277_v16 = vadd.s32 4294967288, %v272_v63  ;;  %v284_v61 = vadd.s32 4294967280, %v272_v63  ;;  %v291_v60 = vadd.s32 4294967272, %v272_v63  ;;  %v1265_v51 = vsub.s32 %v272_v63, %v1260_v17 }
  0x59   :  { %v1268_v50 = vsub.s32 %v277_v16, %v1260_v17  ;;  %v1271_v49 = vsub.s32 %v284_v61, %v1260_v17  ;;  %v1274_v53 = vsub.s32 %v291_v60, %v1260_v17 }
  0xa3   :  { %v113_v23 = vpop.xlane.xlu1 %112 }
  0xa4   :  { %v101_v59 = vpop.xlane.xlu0 %100  ;;  %v200_v45 = vmul.f32 0.00390625, %v113_v23 }
  0xa5   :  { %v196_v44 = vmul.f32 0.00390625, %v101_v59 }
  0xa7   :  { %v116_v47 = vpop.xlane.xlu1 %115 }
  0xa8   :  { %v104_v22 = vpop.xlane.xlu0 %103  ;;  %v201_v57 = vmul.f32 0.00390625, %v116_v47 }
  0xa9   :  { %v197_v56 = vmul.f32 0.00390625, %v104_v22 }
  0xaa   :  { %v305_v47 = vrot.slane %v201_v57, %v1268_v50 }
  0xab   :  { %v119_v7 = vpop.xlane.xlu1 %118  ;;  %v281_v61 = vrot.slane %v197_v56, %v1268_v50 }
  0xac   :  { %v107_v41 = vpop.xlane.xlu0 %106  ;;  %v202_v48 = vmul.f32 0.00390625, %v119_v7 }
  0xad   :  { %v198_v43 = vmul.f32 0.00390625, %v107_v41 }
  0xae   :  { %v310_v60 = vrot.slane %v202_v48, %v1271_v49 }
  0xaf   :  { %v128_v34 = vpop.xlane.xlu1 %127  ;;  %v288_v41 = vrot.slane %v198_v43, %v1271_v49 }
  0xb0   :  { %v125_v46 = vpop.xlane.xlu0 %124  ;;  %v205_v42 = vmul.f32 0.00390625, %v128_v34 }
  0xb1   :  { %v204_v39 = vmul.f32 0.00390625, %v125_v46 }
  0xb2   :  { %v324_v34 = vrot.slane %v205_v42, %v1268_v50 }
  0xb3   :  { %v122_v3 = vpop.xlane.xlu1 %121  ;;  %v320_v46 = vrot.slane %v204_v39, %v1265_v51 }
  0xb4   :  { %v110_v52 = vpop.xlane.xlu0 %109  ;;  %v203_v63 = vmul.f32 0.00390625, %v122_v3  ;;  %v276_v3 = vrot.slane %v196_v44, %v1265_v51 }
  0xb5   :  { %v199_v37 = vmul.f32 0.00390625, %v110_v52  ;;  %v301_v52 = vrot.slane %v200_v45, %v1265_v51  ;;  %v325_v44 = vsel %vm282_vm1, %v324_v34, %v320_v46 }
  0xb6   :  { %v283_v43 = vsel %vm282_vm1, %v281_v61, %v276_v3 }
  0xb7   :  { %v137_v29 = vpop.xlane.xlu1 %136  ;;  %v295_v57 = vrot.slane %v199_v37, %v1274_v53  ;;  %v306_v48 = vsel %vm282_vm1, %v305_v47, %v301_v52  ;;  %v290_v45 = vsel %vm289_vm2, %v288_v41, %v283_v43 }
  0xb8   :  { %v131_v28 = vpop.xlane.xlu0 %130  ;;  %v311_v59 = vsel %vm289_vm2, %v310_v60, %v306_v48 }
  0xb9   :  { %v206_v16 = vmul.f32 0.00390625, %v131_v28  ;;  %v315_v28 = vrot.slane %v203_v63, %v1274_v53  ;;  %v297_v63 = vsel %vm296_vm3, %v295_v57, %v290_v45 }
  0xbb   :  { %v134_v11 = vpop.xlane.xlu1 %133  ;;  %v316_v37 = vsel %vm296_vm3, %v315_v28, %v311_v59 }
  0xbc   :  { %v140_v35 = vpop.xlane.xlu0 %139  ;;  %v207_v22 = vmul.f32 0.00390625, %v134_v11  ;;  %v329_v11 = vrot.slane %v206_v16, %v1271_v49  ;;  %v208_v16 = vmul.f32 0.00390625, %v137_v29  ;;  %v432_v60 = vsel %vm431_vm4, %v316_v37, %v297_v63 }
  0xbd   :  { %v209_v39 = vmul.f32 0.00390625, %v140_v35 }
  0xbe   :  { %v334_v42 = vrot.slane %v207_v22, %v1274_v53  ;;  %v330_v61 = vsel %vm289_vm2, %v329_v11, %v325_v44  ;;  %v339_v3 = vrot.slane %v208_v16, %v1265_v51 }
  0xbf   :  { %v1258_v40 = vpop.xlane.xlu1 %148  ;;  %v343_v22 = vrot.slane %v209_v39, %v1268_v50 }
  0xc0   :  { %v143_v10 = vpop.xlane.xlu0 %142  ;;  %v335_v35 = vsel %vm296_vm3, %v334_v42, %v330_v61  ;;  %v212_v41 = vmul.f32 0.00390625, %v1258_v40 }
  0xc1   :  { %v210_v31 = vmul.f32 0.00390625, %v143_v10  ;;  %v434_v11 = vsel %vm433_vm5, %v335_v35, %v432_v60  ;;  %v344_v39 = vsel %vm282_vm1, %v343_v22, %v339_v3 }
  0xc2   :  { %v358_v59 = vrot.slane %v212_v41, %v1265_v51 }
  0xc3   :  { %v146_v58 = vpop.xlane.xlu1 %145  ;;  %v348_v28 = vrot.slane %v210_v31, %v1271_v49 }
  0xc4   :  { %v152_v62 = vpop.xlane.xlu0 %151  ;;  %v211_v34 = vmul.f32 0.00390625, %v146_v58 }
  0xc5   :  { %v213_v46 = vmul.f32 0.00390625, %v152_v62  ;;  %v349_v44 = vsel %vm289_vm2, %v348_v28, %v344_v39 }
  0xc6   :  { %v353_v31 = vrot.slane %v211_v34, %v1274_v53 }
  0xc7   :  { %v1262_v55 = vpop.xlane.xlu1 %160 }
  0xc8   :  { %v155_v54 = vpop.xlane.xlu0 %154  ;;  %v216_v40 = vmul.f32 0.00390625, %v1262_v55  ;;  %v354_v60 = vsel %vm296_vm3, %v353_v31, %v349_v44 }
  0xc9   :  { %v214_v10 = vmul.f32 0.00390625, %v155_v54  ;;  %v362_v54 = vrot.slane %v213_v46, %v1268_v50  ;;  %v436_v31 = vsel %vm435_vm6, %v354_v60, %v434_v11  ;;  %v908_v11 = vld [vmem:[%s1435_s2] ss:$0 sm:$0xff]  ;;  %s1008_s2 = smov [#allocation5]  }
  0xca   :  { %v377_v61 = vrot.slane %v216_v40, %v1265_v51 }
  0xcb   :  { %v158_v38 = vpop.xlane.xlu1 %157  ;;  %v363_v41 = vsel %vm282_vm1, %v362_v54, %v358_v59 }
  0xcc   :  { %v164_v36 = vpop.xlane.xlu0 %163  ;;  %v215_v48 = vmul.f32 0.00390625, %v158_v38  ;;  %v367_v38 = vrot.slane %v214_v10, %v1271_v49 }
  0xcd   :  { %v217_v29 = vmul.f32 0.00390625, %v164_v36 }
  0xce   :  { %v372_v55 = vrot.slane %v215_v48, %v1274_v53  ;;  %v368_v28 = vsel %vm289_vm2, %v367_v38, %v363_v41  ;;  %v613_v41 = vsub.s32 0, %v1260_v17 }
  0xcf   :  { %v173_v23 = vpop.xlane.xlu1 %172 }
  0xd0   :  { %v167_v56 = vpop.xlane.xlu0 %166  ;;  %v220_v36 = vmul.f32 0.00390625, %v173_v23 }
  0xd1   :  { %v218_v43 = vmul.f32 0.00390625, %v167_v56  ;;  %v381_v56 = vrot.slane %v217_v29, %v1268_v50 }
  0xd2   :  { %v396_v34 = vrot.slane %v220_v36, %v1265_v51 }
  0xd3   :  { %v170_v7 = vpop.xlane.xlu1 %169  ;;  %v382_v10 = vsel %vm282_vm1, %v381_v56, %v377_v61 }
  0xd4   :  { %v176_v47 = vpop.xlane.xlu0 %175  ;;  %v219_v58 = vmul.f32 0.00390625, %v170_v7  ;;  %v386_v7 = vrot.slane %v218_v43, %v1271_v49 }
  0xd5   :  { %v221_v42 = vmul.f32 0.00390625, %v176_v47 }
  0xd6   :  { %v391_v23 = vrot.slane %v219_v58, %v1274_v53  ;;  %v387_v43 = vsel %vm289_vm2, %v386_v7, %v382_v10  ;;  %v651_v10 = vsub.s32 2, %v1260_v17 }
  0xd7   :  { %v185_v52 = vpop.xlane.xlu1 %184  ;;  %v400_v16 = vrot.slane %v221_v42, %v1268_v50 }
  0xd8   :  { %v179_v57 = vpop.xlane.xlu0 %178  ;;  %v224_v35 = vmul.f32 0.00390625, %v185_v52  ;;  %v373_v52 = vsel %vm296_vm3, %v372_v55, %v368_v28  ;;  %v392_v40 = vsel %vm296_vm3, %v391_v23, %v387_v43 }
  0xd9   :  { %v222_v62 = vmul.f32 0.00390625, %v179_v57  ;;  %v401_v42 = vsel %vm282_vm1, %v400_v16, %v396_v34  ;;  %v438_v36 = vsel %vm437_vm7, %v373_v52, %v436_v31  ;;  %v910_v16 = vld [vmem:[%s1437_s4] ss:$0 sm:$0xff]  ;;  %v689_v52 = vsub.s32 4, %v1260_v17 }
  0xda   :  { %v415_v58 = vrot.slane %v224_v35, %v1265_v51  ;;  %v440_v51 = vsel %vm439_vm8, %v392_v40, %v438_v36  ;;  %v727_v40 = vsub.s32 6, %v1260_v17 }
  0xdb   :  { %v182_v45 = vpop.xlane.xlu1 %181  ;;  %v405_v22 = vrot.slane %v222_v62, %v1271_v49 }
  0xdc   :  { %v223_v37 = vmul.f32 0.00390625, %v182_v45  ;;  %v188_v63 = vpop.xlane.xlu0 %187 }
  0xdd   :  { %v225_v47 = vmul.f32 0.00390625, %v188_v63  ;;  %v406_v62 = vsel %vm289_vm2, %v405_v22, %v401_v42  ;;  %v708_v42 = vsub.s32 5, %v1260_v17 }
  0xde   :  { %v410_v46 = vrot.slane %v223_v37, %v1274_v53 }
  0xdf   :  { %v194_v3 = vpop.xlane.xlu1 %193  ;;  %v419_v29 = vrot.slane %v225_v47, %v1268_v50 }
  0xe0   :  { %v191_v57 = vpop.xlane.xlu0 %190  ;;  %v227_v48 = vmul.f32 0.00390625, %v194_v3  ;;  %v411_v50 = vsel %vm296_vm3, %v410_v46, %v406_v62  ;;  %v632_v3 = vsub.s32 1, %v1260_v17  ;;  %v746_v62 = vsub.s32 7, %v1260_v17 }
  0xe1   :  { %v226_v39 = vmul.f32 0.00390625, %v191_v57  ;;  %v420_v45 = vsel %vm282_vm1, %v419_v29, %v415_v58  ;;  %v670_v57 = vsub.s32 3, %v1260_v17 }
  0xe2   :  { %v429_v59 = vrot.slane %v227_v48, %v1274_v53  ;;  %v442_v53 = vsel %vm441_vm9, %v411_v50, %v440_v51 }
  0xe3   :  { %v424_v54 = vrot.slane %v226_v39, %v1271_v49  ;;  %v519_v49 = vld [vmem:[%s1436_s3] sm:$0x3]  ;;  %s896_s3 = sshll.u32 %s1008_s2, 4  ;;  %s897_s3 = int_to_ptr.vmem [resolvable:$true] %s896_s3 }
  0xe4   :  { %933 = vmatpush3.msk.msra.mxu1 %vm531_vm12, %v519_v49  ;;  %s976_s4 = scalar_lea.vmem %s897_s3, 8192  ;;  %p981_p9 = scmp.lt.s32.totalorder %s897_s3, %s897_s3 }
  0xe5   :  { %v425_v44 = vsel %vm289_vm2, %v424_v54, %v420_v45  ;;  %p977_p8 = scmp.ne.s32.totalorder %s897_s3, %s976_s4  ;;  %p982_p10 = scmp.lt.s32.totalorder %s976_s4, %s976_s4 }
  0xe6   :  { %v430_v38 = vsel %vm296_vm3, %v429_v59, %v425_v44 }
  0xe7   :  { %v444_v56 = vsel %vm443_vm10, %v430_v38, %v442_v53  ;;  %p983_p11 = por %p982_p10, %p981_p9 }
  0xe8   :  { %930 = vmatmul.mubr.msk.f32.vlgmr.msra.gmra.mrb[0].mxu0 %vm445_vm11, %v444_v56 }
  0xe9   :  { %p984_p12 = pnand %p983_p11, %p977_p8 }
 0x1bb   :  { %v514_v37 = vpop.f32.mrb[0].mxu0 }
 0x1bc   :  { %v515_v63 = vadd.f32 %v908_v11, %v514_v37  ;;  %v931_v55 = vpop.f32.mrb[1].mxu0 }
 0x1be   :  { %v518_v7 = vmax.f32 %v515_v63, 0.0 }
 0x1c0   :  { %935 = vmatmul.mubr.msk.f32.vlgmr.msra.gmra.mrb[0].mxu1 %vm527_vm13, %v518_v7 }
 0x293   :  { %v601_v47 = vpop.f32.mrb[0].mxu1 }
 0x294   :  { %v602_v61 = vadd.f32 %v910_v16, %v601_v47  ;;  %v936_v23 = vpop.f32.mrb[1].mxu1 }
 0x296   :  { %v913_v35 = vmul.f32 -1.442695, %v602_v61  ;;  %v1521_v61 = vld [vmem:[#allocation8_spill] sm:$0xff] }
 0x298   :  { %950 = vpow2.f32 %v913_v35  ;;  %v1523_v35 = vld [vmem:[#allocation10_spill] sm:$0xff] }
 0x2a2   :  { %v951_v22 = vpop.eup %950 }
 0x2a3   :  { %v608_v60 = vadd.f32 1.0, %v951_v22 }
 0x2a5   :  { %952 = vrcp.f32 %v608_v60  ;;  %v1524_v60 = vld [vmem:[#allocation15_spill] sm:$0xff] }
 0x2af   :  { %v953_v34 = vpop.eup %952 }
 0x2b0   :  { %v614_v46 = vrot.slane %v953_v34, %v613_v41  ;;  %v633_v28 = vrot.slane %v953_v34, %v632_v3  ;;  %v652_v29 = vrot.slane %v953_v34, %v651_v10  ;;  %v671_v48 = vrot.slane %v953_v34, %v670_v57 }
 0x2b1   :  { %v690_v43 = vrot.slane %v953_v34, %v689_v52  ;;  %v709_v39 = vrot.slane %v953_v34, %v708_v42  ;;  %v728_v58 = vrot.slane %v953_v34, %v727_v40  ;;  %v747_v59 = vrot.slane %v953_v34, %v746_v62  ;;  %v1525_v34 = vld [vmem:[#allocation16_spill] sm:$0xff] }
 0x2b2   :  { %620 = vbcast.lane.b32.xlu1 %v614_v46, 264  ;;  %616 = vbcast.lane.b32.xlu0 %v614_v46, 256 }
 0x2b6   :  { %624 = vbcast.lane.b32.xlu1 %v614_v46, 272  ;;  %635 = vbcast.lane.b32.xlu0 %v633_v28, 256 }
 0x2ba   :  { %628 = vbcast.lane.b32.xlu1 %v614_v46, 280  ;;  %643 = vbcast.lane.b32.xlu0 %v633_v28, 272  ;;  %v1526_v46 = vld [vmem:[#allocation11_spill] sm:$0xff] }
 0x2be   :  { %639 = vbcast.lane.b32.xlu1 %v633_v28, 264  ;;  %654 = vbcast.lane.b32.xlu0 %v652_v29, 256 }
 0x2c2   :  { %647 = vbcast.lane.b32.xlu1 %v633_v28, 280  ;;  %662 = vbcast.lane.b32.xlu0 %v652_v29, 272  ;;  %v1527_v28 = vld [vmem:[#allocation12_spill] sm:$0xff] }
 0x2c6   :  { %658 = vbcast.lane.b32.xlu1 %v652_v29, 264  ;;  %673 = vbcast.lane.b32.xlu0 %v671_v48, 256 }
 0x2ca   :  { %666 = vbcast.lane.b32.xlu1 %v652_v29, 280  ;;  %681 = vbcast.lane.b32.xlu0 %v671_v48, 272  ;;  %v1528_v29 = vld [vmem:[#allocation13_spill] sm:$0xff] }
 0x2ce   :  { %677 = vbcast.lane.b32.xlu1 %v671_v48, 264  ;;  %692 = vbcast.lane.b32.xlu0 %v690_v43, 256 }
 0x2d2   :  { %685 = vbcast.lane.b32.xlu1 %v671_v48, 280  ;;  %700 = vbcast.lane.b32.xlu0 %v690_v43, 272  ;;  %v1529_v48 = vld [vmem:[#allocation14_spill] sm:$0xff] }
 0x2d6   :  { %696 = vbcast.lane.b32.xlu1 %v690_v43, 264  ;;  %711 = vbcast.lane.b32.xlu0 %v709_v39, 256 }
 0x2da   :  { %704 = vbcast.lane.b32.xlu1 %v690_v43, 280  ;;  %719 = vbcast.lane.b32.xlu0 %v709_v39, 272 }
 0x2de   :  { %715 = vbcast.lane.b32.xlu1 %v709_v39, 264  ;;  %730 = vbcast.lane.b32.xlu0 %v728_v58, 256 }
 0x2e2   :  { %723 = vbcast.lane.b32.xlu1 %v709_v39, 280  ;;  %738 = vbcast.lane.b32.xlu0 %v728_v58, 272  ;;  %v1530_v39 = vld [vmem:[#allocation17_spill] sm:$0xff] }
 0x2e6   :  { %734 = vbcast.lane.b32.xlu1 %v728_v58, 264  ;;  %749 = vbcast.lane.b32.xlu0 %v747_v59, 256 }
 0x2ea   :  { %742 = vbcast.lane.b32.xlu1 %v728_v58, 280  ;;  %757 = vbcast.lane.b32.xlu0 %v747_v59, 272  ;;  %v1531_v58 = vld [vmem:[#allocation18_spill] sm:$0xff] }
 0x2ee   :  { %753 = vbcast.lane.b32.xlu1 %v747_v59, 264 }
 0x2f2   :  { %761 = vbcast.lane.b32.xlu1 %v747_v59, 280  ;;  %v1532_v59 = vld [vmem:[#allocation23_spill] sm:$0xff] }
 0x324   :  { %v621_v31 = vpop.permute.xlu1 %620  ;;  %v617_v50 = vpop.permute.xlu0 %616 }
 0x325   :  { %v765_v54 = vmul.f32 %v621_v31, %v1070_v8  ;;  %v766_v36 = vmul.f32 %v621_v31, %v1072_v9  ;;  %v763_v45 = vmul.f32 %v617_v50, %v1058_v2  ;;  %v764_v44 = vmul.f32 %v617_v50, %v1062_v4  ;;  %v1533_v50 = vld [vmem:[#allocation24_spill] sm:$0xff] }
 0x327   :  { %829 = vst [vmem:[#allocation5 + $0x10] sm:$0xff] %v765_v54  ;;  %830 = vst [vmem:[#allocation5 + $0x18] sm:$0xff] %v766_v36 }
 0x328   :  { %827 = vst [vmem:[#allocation5] sm:$0xff] %v763_v45  ;;  %828 = vst [vmem:[#allocation5 + $0x8] sm:$0xff] %v764_v44  ;;  %v625_v17 = vpop.permute.xlu1 %624  ;;  %v636_v51 = vpop.permute.xlu0 %635  ;;  %v1534_v44 = vld [vmem:[#allocation19_spill] sm:$0xff] }
 0x329   :  { %v767_v38 = vmul.f32 %v625_v17, %v1082_v14  ;;  %v768_v53 = vmul.f32 %v625_v17, %v1084_v15  ;;  %v771_v56 = vmul.f32 %v636_v51, %v1054_v0  ;;  %v772_v8 = vmul.f32 %v636_v51, %v1056_v1  ;;  %v1535_v51 = vld [vmem:[#allocation20_spill] sm:$0xff] }
 0x32b   :  { %831 = vst [vmem:[#allocation5 + $0x20] sm:$0xff] %v767_v38  ;;  %832 = vst [vmem:[#allocation5 + $0x28] sm:$0xff] %v768_v53  ;;  %v1536_v53 = vld [vmem:[#allocation21_spill] sm:$0xff] }
 0x32c   :  { %835 = vst [vmem:[#allocation5 + $0x40] sm:$0xff] %v771_v56  ;;  %836 = vst [vmem:[#allocation5 + $0x48] sm:$0xff] %v772_v8  ;;  %v629_v2 = vpop.permute.xlu1 %628  ;;  %v644_v4 = vpop.permute.xlu0 %643  ;;  %v1537_v8 = vld [vmem:[#allocation22_spill] sm:$0xff] }
 0x32d   :  { %v769_v9 = vmul.f32 %v629_v2, %v1106_v26  ;;  %v770_v49 = vmul.f32 %v629_v2, %v1108_v27  ;;  %v775_v11 = vmul.f32 %v644_v4, %v1078_v12  ;;  %v776_v14 = vmul.f32 %v644_v4, %v1080_v13 }
 0x32f   :  { %833 = vst [vmem:[#allocation5 + $0x30] sm:$0xff] %v769_v9  ;;  %834 = vst [vmem:[#allocation5 + $0x38] sm:$0xff] %v770_v49  ;;  %v1538_v49 = vld [vmem:[#allocation25_spill] sm:$0xff] }
 0x330   :  { %839 = vst [vmem:[#allocation5 + $0x60] sm:$0xff] %v775_v11  ;;  %840 = vst [vmem:[#allocation5 + $0x68] sm:$0xff] %v776_v14  ;;  %v640_v0 = vpop.permute.xlu1 %639  ;;  %v655_v1 = vpop.permute.xlu0 %654  ;;  %v1539_v14 = vld [vmem:[#allocation26_spill] sm:$0xff] }
 0x331   :  { %v773_v15 = vmul.f32 %v640_v0, %v1064_v5  ;;  %v774_v37 = vmul.f32 %v640_v0, %v1066_v6  ;;  %v779_v63 = vmul.f32 %v655_v1, %v1094_v20  ;;  %v780_v26 = vmul.f32 %v655_v1, %v1096_v21  ;;  %v1540_v1 = vld [vmem:[#allocation31_spill] sm:$0xff] }
 0x333   :  { %837 = vst [vmem:[#allocation5 + $0x50] sm:$0xff] %v773_v15  ;;  %838 = vst [vmem:[#allocation5 + $0x58] sm:$0xff] %v774_v37  ;;  %v1541_v37 = vld [vmem:[#allocation32_spill] sm:$0xff] }
 0x334   :  { %843 = vst [vmem:[#allocation5 + $0x80] sm:$0xff] %v779_v63  ;;  %844 = vst [vmem:[#allocation5 + $0x88] sm:$0xff] %v780_v26  ;;  %v648_v12 = vpop.permute.xlu1 %647  ;;  %v663_v13 = vpop.permute.xlu0 %662 }
 0x335   :  { %v777_v27 = vmul.f32 %v648_v12, %v1102_v24  ;;  %v778_v55 = vmul.f32 %v648_v12, %v1104_v25  ;;  %v783_v7 = vmul.f32 %v663_v13, %v1118_v32  ;;  %v784_v5 = vmul.f32 %v663_v13, %v1120_v33  ;;  %v1522_v33 = vld [vmem:[#allocation9_spill] sm:$0xff]  ;;  %v1542_v13 = vld [vmem:[#allocation27_spill] sm:$0xff] }
 0x337   :  { %841 = vst [vmem:[#allocation5 + $0x70] sm:$0xff] %v777_v27  ;;  %842 = vst [vmem:[#allocation5 + $0x78] sm:$0xff] %v778_v55  ;;  %v1543_v55 = vld [vmem:[#allocation28_spill] sm:$0xff] }
 0x338   :  { %847 = vst [vmem:[#allocation5 + $0xa0] sm:$0xff] %v783_v7  ;;  %848 = vst [vmem:[#allocation5 + $0xa8] sm:$0xff] %v784_v5  ;;  %v659_v6 = vpop.permute.xlu1 %658  ;;  %v674_v20 = vpop.permute.xlu0 %673  ;;  %v1544_v5 = vld [vmem:[#allocation29_spill] sm:$0xff] }
 0x339   :  { %v781_v21 = vmul.f32 %v659_v6, %v1090_v18  ;;  %v782_v16 = vmul.f32 %v659_v6, %v1092_v19  ;;  %v787_v47 = vmul.f32 %v674_v20, %v1114_v30  ;;  %v788_v24 = vmul.f32 %v674_v20, %v1521_v61  ;;  %v1545_v20 = vld [vmem:[#allocation30_spill] sm:$0xff]  ;;  %v1546_v61 = vld [vmem:[#allocation33_spill] sm:$0xff] }
 0x33b   :  { %845 = vst [vmem:[#allocation5 + $0x90] sm:$0xff] %v781_v21  ;;  %846 = vst [vmem:[#allocation5 + $0x98] sm:$0xff] %v782_v16 }
 0x33c   :  { %851 = vst [vmem:[#allocation5 + $0xc0] sm:$0xff] %v787_v47  ;;  %852 = vst [vmem:[#allocation5 + $0xc8] sm:$0xff] %v788_v24  ;;  %v667_v25 = vpop.permute.xlu1 %666  ;;  %v682_v32 = vpop.permute.xlu0 %681 }
 0x33d   :  { %v785_v23 = vmul.f32 %v667_v25, %v1522_v33  ;;  %v786_v22 = vmul.f32 %v667_v25, %v1523_v35  ;;  %v791_v41 = vmul.f32 %v682_v32, %v1524_v60  ;;  %v792_v18 = vmul.f32 %v682_v32, %v1525_v34  ;;  %v1547_v25 = vld [vmem:[#allocation34_spill] sm:$0xff]  ;;  %v1548_v33 = vld [vmem:[#allocation39_spill] sm:$0xff]  ;;  %v1549_v35 = vld [vmem:[#allocation40_spill] sm:$0xff] }
 0x33e   :  { %v1550_v34 = vld [vmem:[#allocation35_spill] sm:$0xff] }
 0x33f   :  { %849 = vst [vmem:[#allocation5 + $0xb0] sm:$0xff] %v785_v23  ;;  %850 = vst [vmem:[#allocation5 + $0xb8] sm:$0xff] %v786_v22 }
 0x340   :  { %855 = vst [vmem:[#allocation5 + $0xe0] sm:$0xff] %v791_v41  ;;  %856 = vst [vmem:[#allocation5 + $0xe8] sm:$0xff] %v792_v18  ;;  %v678_v19 = vpop.permute.xlu1 %677  ;;  %v693_v30 = vpop.permute.xlu0 %692 }
 0x341   :  { %v789_v3 = vmul.f32 %v678_v19, %v1526_v46  ;;  %v790_v10 = vmul.f32 %v678_v19, %v1527_v28  ;;  %v795_v57 = vmul.f32 %v693_v30, %v1528_v29  ;;  %v796_v52 = vmul.f32 %v693_v30, %v1529_v48  ;;  %v1551_v19 = vld [vmem:[#allocation36_spill] sm:$0xff]  ;;  %v1552_v46 = vld [vmem:[#allocation37_spill] sm:$0xff]  ;;  %v1553_v28 = vld [vmem:[#allocation38_spill] sm:$0xff] }
 0x342   :  { %v1554_v48 = vld [vmem:[#allocation41_spill] sm:$0xff] }
 0x343   :  { %853 = vst [vmem:[#allocation5 + $0xd0] sm:$0xff] %v789_v3  ;;  %854 = vst [vmem:[#allocation5 + $0xd8] sm:$0xff] %v790_v10 }
 0x344   :  { %859 = vst [vmem:[#allocation5 + $0x100] sm:$0xff] %v795_v57  ;;  %860 = vst [vmem:[#allocation5 + $0x108] sm:$0xff] %v796_v52  ;;  %v686_v43 = vpop.permute.xlu1 %685  ;;  %v701_v42 = vpop.permute.xlu0 %700 }
 0x345   :  { %v793_v40 = vmul.f32 %v686_v43, %v1530_v39  ;;  %v794_v62 = vmul.f32 %v686_v43, %v1531_v58  ;;  %v799_v31 = vmul.f32 %v701_v42, %v1532_v59  ;;  %v800_v54 = vmul.f32 %v701_v42, %v1533_v50  ;;  %v1555_v43 = vld [vmem:[#allocation42_spill] sm:$0xff]  ;;  %v1556_v39 = vld [vmem:[#allocation47_spill] sm:$0xff]  ;;  %v1557_v58 = vld [vmem:[#allocation48_spill] sm:$0xff] }
 0x347   :  { %857 = vst [vmem:[#allocation5 + $0xf0] sm:$0xff] %v793_v40  ;;  %858 = vst [vmem:[#allocation5 + $0xf8] sm:$0xff] %v794_v62 }
 0x348   :  { %863 = vst [vmem:[#allocation5 + $0x120] sm:$0xff] %v799_v31  ;;  %864 = vst [vmem:[#allocation5 + $0x128] sm:$0xff] %v800_v54  ;;  %v697_v36 = vpop.permute.xlu1 %696  ;;  %v712_v45 = vpop.permute.xlu0 %711  ;;  %v1558_v31 = vld [vmem:[#allocation43_spill] sm:$0xff]  ;;  %v1559_v54 = vld [vmem:[#allocation44_spill] sm:$0xff] }
 0x349   :  { %v797_v17 = vmul.f32 %v697_v36, %v1534_v44  ;;  %v798_v38 = vmul.f32 %v697_v36, %v1535_v51  ;;  %v803_v56 = vmul.f32 %v712_v45, %v1536_v53  ;;  %v804_v2 = vmul.f32 %v712_v45, %v1537_v8  ;;  %v1560_v44 = vld [vmem:[#allocation45_spill] sm:$0xff]  ;;  %v1561_v51 = vld [vmem:[#allocation46_spill] sm:$0xff] }
 0x34b   :  { %861 = vst [vmem:[#allocation5 + $0x110] sm:$0xff] %v797_v17  ;;  %862 = vst [vmem:[#allocation5 + $0x118] sm:$0xff] %v798_v38 }
 0x34c   :  { %867 = vst [vmem:[#allocation5 + $0x140] sm:$0xff] %v803_v56  ;;  %868 = vst [vmem:[#allocation5 + $0x148] sm:$0xff] %v804_v2  ;;  %v705_v4 = vpop.permute.xlu1 %704  ;;  %v720_v9 = vpop.permute.xlu0 %719 }
 0x34d   :  { %v801_v11 = vmul.f32 %v705_v4, %v1538_v49  ;;  %v802_v0 = vmul.f32 %v705_v4, %v1539_v14  ;;  %v807_v15 = vmul.f32 %v720_v9, %v1540_v1  ;;  %v808_v63 = vmul.f32 %v720_v9, %v1541_v37 }
 0x34f   :  { %865 = vst [vmem:[#allocation5 + $0x130] sm:$0xff] %v801_v11  ;;  %866 = vst [vmem:[#allocation5 + $0x138] sm:$0xff] %v802_v0 }
 0x350   :  { %871 = vst [vmem:[#allocation5 + $0x160] sm:$0xff] %v807_v15  ;;  %872 = vst [vmem:[#allocation5 + $0x168] sm:$0xff] %v808_v63  ;;  %v716_v26 = vpop.permute.xlu1 %715  ;;  %v731_v12 = vpop.permute.xlu0 %730 }
 0x351   :  { %v805_v27 = vmul.f32 %v716_v26, %v1542_v13  ;;  %v806_v7 = vmul.f32 %v716_v26, %v1543_v55  ;;  %v811_v6 = vmul.f32 %v731_v12, %v1544_v5  ;;  %v812_v21 = vmul.f32 %v731_v12, %v1545_v20 }
 0x353   :  { %869 = vst [vmem:[#allocation5 + $0x150] sm:$0xff] %v805_v27  ;;  %870 = vst [vmem:[#allocation5 + $0x158] sm:$0xff] %v806_v7 }
 0x354   :  { %875 = vst [vmem:[#allocation5 + $0x180] sm:$0xff] %v811_v6  ;;  %876 = vst [vmem:[#allocation5 + $0x188] sm:$0xff] %v812_v21  ;;  %v724_v16 = vpop.permute.xlu1 %723  ;;  %v739_v47 = vpop.permute.xlu0 %738 }
 0x355   :  { %v809_v24 = vmul.f32 %v724_v16, %v1546_v61  ;;  %v810_v32 = vmul.f32 %v724_v16, %v1547_v25  ;;  %v815_v23 = vmul.f32 %v739_v47, %v1548_v33  ;;  %v816_v22 = vmul.f32 %v739_v47, %v1549_v35 }
 0x357   :  { %873 = vst [vmem:[#allocation5 + $0x170] sm:$0xff] %v809_v24  ;;  %874 = vst [vmem:[#allocation5 + $0x178] sm:$0xff] %v810_v32 }
 0x358   :  { %879 = vst [vmem:[#allocation5 + $0x1a0] sm:$0xff] %v815_v23  ;;  %880 = vst [vmem:[#allocation5 + $0x1a8] sm:$0xff] %v816_v22  ;;  %v735_v60 = vpop.permute.xlu1 %734  ;;  %v750_v41 = vpop.permute.xlu0 %749 }
 0x359   :  { %v813_v18 = vmul.f32 %v735_v60, %v1550_v34  ;;  %v814_v30 = vmul.f32 %v735_v60, %v1551_v19  ;;  %v819_v3 = vmul.f32 %v750_v41, %v1552_v46  ;;  %v820_v10 = vmul.f32 %v750_v41, %v1553_v28 }
 0x35b   :  { %877 = vst [vmem:[#allocation5 + $0x190] sm:$0xff] %v813_v18  ;;  %878 = vst [vmem:[#allocation5 + $0x198] sm:$0xff] %v814_v30 }
 0x35c   :  { %883 = vst [vmem:[#allocation5 + $0x1c0] sm:$0xff] %v819_v3  ;;  %884 = vst [vmem:[#allocation5 + $0x1c8] sm:$0xff] %v820_v10  ;;  %v743_v29 = vpop.permute.xlu1 %742  ;;  %v758_v57 = vpop.permute.xlu0 %757 }
 0x35d   :  { %v817_v52 = vmul.f32 %v743_v29, %v1554_v48  ;;  %v818_v42 = vmul.f32 %v743_v29, %v1555_v43  ;;  %v823_v40 = vmul.f32 %v758_v57, %v1556_v39  ;;  %v824_v62 = vmul.f32 %v758_v57, %v1557_v58 }
 0x35f   :  { %881 = vst [vmem:[#allocation5 + $0x1b0] sm:$0xff] %v817_v52  ;;  %882 = vst [vmem:[#allocation5 + $0x1b8] sm:$0xff] %v818_v42 }
 0x360   :  { %887 = vst [vmem:[#allocation5 + $0x1e0] sm:$0xff] %v823_v40  ;;  %888 = vst [vmem:[#allocation5 + $0x1e8] sm:$0xff] %v824_v62  ;;  %v754_v59 = vpop.permute.xlu1 %753 }
 0x361   :  { %v821_v50 = vmul.f32 %v754_v59, %v1558_v31  ;;  %v822_v36 = vmul.f32 %v754_v59, %v1559_v54 }
 0x363   :  { %885 = vst [vmem:[#allocation5 + $0x1d0] sm:$0xff] %v821_v50  ;;  %886 = vst [vmem:[#allocation5 + $0x1d8] sm:$0xff] %v822_v36 }
 0x364   :  { %v762_v45 = vpop.permute.xlu1 %761 }
 0x365   :  { %v825_v17 = vmul.f32 %v762_v45, %v1560_v44  ;;  %v826_v38 = vmul.f32 %v762_v45, %v1561_v51 }
 0x367   :  { %889 = vst [vmem:[#allocation5 + $0x1f0] sm:$0xff] %v825_v17  ;;  %890 = vst [vmem:[#allocation5 + $0x1f8] sm:$0xff] %v826_v38 }
 0x368   :  { %987 = shalt.err (!%p984_p12)
}
 0x369   :  { %s988_s21 = scalar_lea.hbm %s1438_s5, 8192 }
 0x36a   :  { %p989_p13 = scmp.ne.s32.totalorder %s1438_s5, %s988_s21  ;;  %p992_p0 = scmp.lt.u32.totalorder %s988_s21, %s1438_s5 }
 0x36c   :  { %p994_p1 = pnand %p992_p0, %p989_p13 }
 0x36e   :  { %997 = shalt.err (!%p994_p1)
}
 0x36f   :  { %902 = dma.vmem_to_hbm [thread:$0]  %s897_s3, 8192, %s1438_s5, [#allocation4], %s1003_s28, %s1003_s28, %s1004_s29  }
 0x370   :  { %1000 = dma.done.wait [#allocation4], 8192  }
 0x371   :  { %1001 = vsyncadd [#allocation4], 4294959104 }
 0x372   :  { %906 = vsyncpa [#allocation3], 1 }
 0x373   :  { %907 = vsyncpa [#allocation4], 1 }

</bundles_post_ra>
